<compile_context>
chip_gen: v6e
topology: v6e:2x2x1
jax: 0.10.0
libtpu: 0.0.40
codegen_flags: <defaults>
</compile_context>

<pallas_src>
import functools

import jax
import jax.numpy as jnp
from jax.experimental import pallas as pl
from jax.experimental.pallas import tpu as pltpu


def _cdiv(a, b):
    return (a + b - 1) // b


def _round_up(a, b):
    return _cdiv(a, b) * b


def _physical_vmem_bytes():
    try:
        return int(pltpu.get_tpu_info().vmem_capacity_bytes)
    except Exception:
        return 64 << 20  # conservative fallback == v7x per-TensorCore VMEM


def _af_kernel(g_ref, x_ref, wg_ref, wx_ref, b_ref, wp_ref, tp_ref, o_ref, *,
               unroll_channels, psi_on_mxu):
    """One (channels, TM-pixel) tile of the fused attention gate.

    Channels on sublanes, pixels on lanes:
      g_ref: (F_g, TM)   x_ref/o_ref: (F_l, TM)
      wg_ref: (F_int, F_g), wx_ref: (F_int, F_l)  (BN scale folded, x.dtype)
      b_ref:  (F_int, 1) f32   combined conv-bias + BN shift of both branches
      wp_ref: (F_int, 1) f32 (VPU path) or (1, F_int) f32 (MXU path)
      tp_ref: (1, 1) f32
    """
    g = g_ref[...]
    x = x_ref[...]

    if unroll_channels:
        # Tiny-channel path: the MXU would pad the contraction to 128/256
        # lanes at <4% utilisation and pay push+drain latency twice per tile;
        # a handful of broadcast FMAs on the VPU is cheaper.
        f_int = b_ref.shape[0]
        tm = g.shape[-1]
        a = jnp.broadcast_to(b_ref[...], (f_int, tm))
        wg = wg_ref[...].astype(jnp.float32)
        wx = wx_ref[...].astype(jnp.float32)
        gf = g.astype(jnp.float32)
        xf = x.astype(jnp.float32)
        for c in range(gf.shape[0]):            # unrolled at trace time
            a = a + wg[:, c:c + 1] * gf[c:c + 1, :]
        for c in range(xf.shape[0]):
            a = a + wx[:, c:c + 1] * xf[c:c + 1, :]
    else:
        # Branch 1x1 convs == channel matmuls on the MXU (f32 accumulate).
        a = jnp.dot(wg_ref[...], g, preferred_element_type=jnp.float32)
        a = a + jnp.dot(wx_ref[...], x, preferred_element_type=jnp.float32)
        a = a + b_ref[...]
    a = jnp.maximum(a, 0.0)                                    # (F_int, TM)

    if psi_on_mxu:
        # Large F_int: single-output-channel psi conv as a (1,F_int)x(F_int,TM)
        # dot -> multiplies + reduction move onto the otherwise idle MXU.
        p = jnp.dot(wp_ref[...], a, preferred_element_type=jnp.float32)
        p = p + tp_ref[...]
    else:
        # Small F_int: lane-dense VPU multiply + sublane (XLU) reduce.
        p = jnp.sum(a * wp_ref[...], axis=0, keepdims=True) + tp_ref[...]
    p = jax.nn.sigmoid(p)                                      # (1, TM)

    # Gated output in the input dtype (bf16 stays bf16 on v6e/v7x; psi is a
    # [0,1] gate so the f32 upcast of x buys nothing); unmasked stores.
    o_ref[...] = (x * p.astype(x.dtype)).astype(o_ref.dtype)


def af_block_pallas(g, x, params, *, tm=4096, vmem_budget_bytes=None):
    """g: (N, F_g, H, W), x: (N, F_l, H, W)  -> (N, F_l, H, W)."""
    N, Fg, H, W = g.shape
    Nx, Fl, Hx, Wx = x.shape
    assert (N, H, W) == (Nx, Hx, Wx)
    Fint = params["wg"].shape[0]
    HW = H * W
    g_isz = jnp.dtype(g.dtype).itemsize
    x_isz = jnp.dtype(x.dtype).itemsize

    physical_vmem = _physical_vmem_bytes()
    if vmem_budget_bytes is None:
        # ~5/8 of per-core VMEM: ~80 MiB on the 128 MiB parts (v5e/v6e),
        # ~40 MiB on v7x's 64 MiB part -- leaves compiler/second-core headroom.
        vmem_budget_bytes = physical_vmem * 5 // 8

    # Per-pixel-column VMEM bytes: double-buffered g/x/out tiles plus the f32
    # intermediates (`a`, psi row, gating temp) that exist once per tile.
    per_col = 2 * (Fg * g_isz + 2 * Fl * x_isz) + (Fint + Fl + 1) * 4
    weight_bytes = 2 * (Fint * (Fg + Fl) * x_isz + (2 * Fint + 2) * 4)
    cols_fit = max(vmem_budget_bytes - weight_bytes, 0) // per_col
    tm_cap = max(128, (min(int(tm), cols_fit) // 128) * 128)

    # Pixel tiling: never collapse to 128 for awkward HW -- take cdiv tiles of
    # the largest width fitting the budget; the math is purely per-pixel, so
    # the (at most one tile of) padded pixels are simply sliced off afterwards.
    HWp = _round_up(HW, 128)
    nt = _cdiv(HWp, tm_cap)
    TM = _round_up(_cdiv(HWp, nt), 128)
    HWt = nt * TM

    # Free reshape (no transpose): channels -> sublanes, pixels -> lanes.
    g3 = g.reshape(N, Fg, HW)
    x3 = x.reshape(N, Fl, HW)
    if HWt != HW:
        # TODO(synk): have the producer emit a tile-aligned pixel count so this
        # extra HBM pad/slice pass disappears on awkward spatial sizes.
        pad = ((0, 0), (0, 0), (0, HWt - HW))
        g3 = jnp.pad(g3, pad)
        x3 = jnp.pad(x3, pad)

    # Pixel-tile axis leads the grid so megacore sharding (v7x: 2 TCs) splits
    # the many pixel tiles instead of the tiny (often odd) batch axis.
    grid = (nt, N)

    unroll_channels = Fg <= 8 and Fl <= 8 and Fint <= 16
    psi_on_mxu = Fint >= 32

    # Matmul operands follow the input dtype (bf16 inputs stay bf16 on the
    # MXU, halving HBM read bytes); shift / psi params stay f32.
    wg = params["wg"].astype(x.dtype)
    wx = params["wx"].astype(x.dtype)
    b = params["b"].astype(jnp.float32)
    wp = params["wp"].astype(jnp.float32)          # (F_int, 1)
    if psi_on_mxu:
        wp = wp.reshape(1, Fint)                   # row layout for the MXU dot
    tp = params["tp"].astype(jnp.float32)

    def full(shape):
        return pl.BlockSpec(shape, lambda j, n: (0,) * len(shape))

    flops = (2 * N * HWt * Fint * (Fg + Fl)          # branch matmuls
             + N * HWt * (2 * Fint + 2 * Fl + 4))    # psi + gate elementwise
    bytes_accessed = (N * HWt * (Fg * g_isz + 2 * Fl * x_isz)
                      + (wg.size + wx.size) * x_isz
                      + (b.size + wp.size + tp.size) * 4)
    cost = pl.CostEstimate(flops=int(flops),
                           transcendentals=int(N * HWt),
                           bytes_accessed=int(bytes_accessed))

    need = (2 * TM * (Fg * g_isz + 2 * Fl * x_isz)
            + TM * (Fint + Fl + 1) * 4 + weight_bytes + (4 << 20))
    vmem_limit = int(min(max(need, 32 << 20),
                         max(physical_vmem - (12 << 20), 32 << 20)))

    kernel = functools.partial(_af_kernel,
                               unroll_channels=unroll_channels,
                               psi_on_mxu=psi_on_mxu)

    out3 = pl.pallas_call(
        kernel,
        out_shape=jax.ShapeDtypeStruct((N, Fl, HWt), x.dtype),
        grid=grid,
        in_specs=[
            pl.BlockSpec((None, Fg, TM), lambda j, n: (n, 0, j)),   # g tile
            pl.BlockSpec((None, Fl, TM), lambda j, n: (n, 0, j)),   # x tile
            full(wg.shape),      # Wg'  (BN-scale folded)
            full(wx.shape),      # Wx'
            full(b.shape),       # combined shift
            full(wp.shape),      # psi weights (column or row layout)
            full(tp.shape),      # psi shift
        ],
        out_specs=pl.BlockSpec((None, Fl, TM), lambda j, n: (n, 0, j)),
        compiler_params=pltpu.CompilerParams(
            dimension_semantics=("parallel", "parallel"),
            vmem_limit_bytes=vmem_limit),
        cost_estimate=cost,
    )(g3, x3, wg, wx, b, wp, tp)

    out3 = out3[:, :, :HW] if HWt != HW else out3
    return out3.reshape(N, Fl, H, W)


def make_params(key, F_g, F_l, F_int, eps=1e-5):
    """Deterministic synthetic parameters; eval-mode BN (fresh stats) folded
    into the conv weights / a single combined shift on the host."""
    ks = jax.random.split(key, 6)
    # PyTorch conv1x1 weights are (C_out, C_in); generate them directly so.
    wg = jax.random.normal(ks[0], (F_int, F_g), jnp.float32) * 0.1
    bg = jax.random.normal(ks[1], (F_int,), jnp.float32) * 0.1
    wx = jax.random.normal(ks[2], (F_int, F_l), jnp.float32) * 0.1
    bx = jax.random.normal(ks[3], (F_int,), jnp.float32) * 0.1
    wp = jax.random.normal(ks[4], (F_int,), jnp.float32) * 0.1
    bp = jax.random.normal(ks[5], (1,), jnp.float32) * 0.1

    def bn_scale_shift(bias, c):
        gamma = jnp.ones((c,), jnp.float32)
        beta = jnp.zeros((c,), jnp.float32)
        rmean = jnp.zeros((c,), jnp.float32)
        rvar = jnp.ones((c,), jnp.float32)
        scale = gamma / jnp.sqrt(rvar + eps)
        shift = beta + (bias - rmean) * scale
        return scale, shift

    sg, tg = bn_scale_shift(bg, F_int)
    sx, tx = bn_scale_shift(bx, F_int)
    sp, tp = bn_scale_shift(bp, 1)

    return dict(
        wg=wg * sg[:, None],        # (F_int, F_g)  BN scale folded in
        wx=wx * sx[:, None],        # (F_int, F_l)
        b=(tg + tx)[:, None],       # (F_int, 1)    both branch shifts combined
        wp=(wp * sp)[:, None],      # (F_int, 1)    psi weight column
        tp=tp[None, :],             # (1, 1)
    )


def af_block_ref(g, x, p):
    """Pure-JAX reference of the same (eval-mode, BN-folded) forward pass."""
    N, Fg, H, W = g.shape
    Fl = x.shape[1]
    HW = H * W
    gm = g.reshape(N, Fg, HW).astype(jnp.float32)
    xm = x.reshape(N, Fl, HW).astype(jnp.float32)
    hp = jax.lax.Precision.HIGHEST
    a = (jnp.einsum("fc,ncm->nfm", p["wg"], gm, precision=hp)
         + jnp.einsum("fc,ncm->nfm", p["wx"], xm, precision=hp)
         + p["b"][None])
    a = jnp.maximum(a, 0.0)
    psi = jax.nn.sigmoid(jnp.sum(a * p["wp"][None], axis=1, keepdims=True)
                         + p["tp"][None])
    out = xm * psi
    return out.reshape(N, Fl, H, W).astype(x.dtype)


if __name__ == "__main__":
    key = jax.random.PRNGKey(0)
    k_g, k_x, k_p, k_g2, k_x2, k_p2 = jax.random.split(key, 6)

    # 1) Tiny-channel f32 config (unrolled VPU path, psi as a sublane reduce).
    N, F_g, F_l, F_int, Hd, Wd = 2, 4, 4, 8, 16, 16
    g = jax.random.normal(k_g, (N, F_g, Hd, Wd), jnp.float32)
    x = jax.random.normal(k_x, (N, F_l, Hd, Wd), jnp.float32)
    params = make_params(k_p, F_g, F_l, F_int)

    out = jax.block_until_ready(af_block_pallas(g, x, params))
    ref = af_block_ref(g, x, params)
    assert out.shape == (N, F_l, Hd, Wd)
    assert jnp.allclose(out, ref, atol=1e-4, rtol=1e-4), \
        float(jnp.max(jnp.abs(out - ref)))

    # 2) Wider-channel bf16 config (MXU branch matmuls, psi on the MXU, bf16
    #    gating) -- the dtype/shape regime of the real decoder stages.
    N2, F_g2, F_l2, F_int2 = 2, 32, 32, 64
    g2 = jax.random.normal(k_g2, (N2, F_g2, Hd, Wd), jnp.float32).astype(jnp.bfloat16)
    x2 = jax.random.normal(k_x2, (N2, F_l2, Hd, Wd), jnp.float32).astype(jnp.bfloat16)
    params2 = make_params(k_p2, F_g2, F_l2, F_int2)

    out2 = jax.block_until_ready(af_block_pallas(g2, x2, params2))
    # Reference uses the same bf16-rounded matmul weights the kernel sees.
    p_ref = dict(params2)
    p_ref["wg"] = params2["wg"].astype(jnp.bfloat16).astype(jnp.float32)
    p_ref["wx"] = params2["wx"].astype(jnp.bfloat16).astype(jnp.float32)
    ref2 = af_block_ref(g2, x2, p_ref).astype(jnp.float32)
    assert out2.shape == (N2, F_l2, Hd, Wd)
    assert jnp.allclose(out2.astype(jnp.float32), ref2, atol=2e-2, rtol=5e-2), \
        float(jnp.max(jnp.abs(out2.astype(jnp.float32) - ref2)))

    print("KERNEL_OK")
</pallas_src>

<mosaic_0001>
module attributes {stable_mosaic.version = 11 : i64} {
  func.func @_af_kernel(%arg0: i32, %arg1: i32, %arg2: memref<1x4x256xf32, #tpu.memory_space<vmem>>, %arg3: memref<1x4x256xf32, #tpu.memory_space<vmem>>, %arg4: memref<8x4xf32, #tpu.memory_space<vmem>>, %arg5: memref<8x4xf32, #tpu.memory_space<vmem>>, %arg6: memref<8x1xf32, #tpu.memory_space<vmem>>, %arg7: memref<8x1xf32, #tpu.memory_space<vmem>>, %arg8: memref<1x1xf32, #tpu.memory_space<vmem>>, %arg9: memref<1x4x256xf32, #tpu.memory_space<vmem>>) attributes {dimension_semantics = [#tpu.dimension_semantics<parallel>, #tpu.dimension_semantics<parallel>], iteration_bounds = array<i64: 1, 2>, scalar_prefetch = 0 : i64, scratch_operands = 0 : i64, tpu.core_type = #tpu.core_type<tc>, window_params = [{transform_indices = @transform_0, window_bounds = array<i64: 1, 4, 256>}, {transform_indices = @transform_1, window_bounds = array<i64: 1, 4, 256>}, {pipeline_mode = #tpu.pipeline_mode<synchronous>, transform_indices = @transform_2, window_bounds = array<i64: 8, 4>}, {pipeline_mode = #tpu.pipeline_mode<synchronous>, transform_indices = @transform_3, window_bounds = array<i64: 8, 4>}, {pipeline_mode = #tpu.pipeline_mode<synchronous>, transform_indices = @transform_4, window_bounds = array<i64: 8, 1>}, {pipeline_mode = #tpu.pipeline_mode<synchronous>, transform_indices = @transform_5, window_bounds = array<i64: 8, 1>}, {pipeline_mode = #tpu.pipeline_mode<synchronous>, transform_indices = @transform_6, window_bounds = array<i64: 1, 1>}, {transform_indices = @transform_7, window_bounds = array<i64: 1, 4, 256>}]} {
    %c0 = arith.constant 0 : index
    %c0_0 = arith.constant 0 : index
    %c0_1 = arith.constant 0 : index
    %0 = vector.load %arg2[%c0, %c0_0, %c0_1] : memref<1x4x256xf32, #tpu.memory_space<vmem>>, vector<1x4x256xf32>
    %1 = vector.shape_cast %0 : vector<1x4x256xf32> to vector<4x256xf32>
    %c0_2 = arith.constant 0 : index
    %c0_3 = arith.constant 0 : index
    %c0_4 = arith.constant 0 : index
    %2 = vector.load %arg3[%c0_2, %c0_3, %c0_4] : memref<1x4x256xf32, #tpu.memory_space<vmem>>, vector<1x4x256xf32>
    %3 = vector.shape_cast %2 : vector<1x4x256xf32> to vector<4x256xf32>
    %c0_5 = arith.constant 0 : index
    %c0_6 = arith.constant 0 : index
    %4 = vector.load %arg6[%c0_5, %c0_6] : memref<8x1xf32, #tpu.memory_space<vmem>>, vector<8x1xf32>
    %5 = vector.shape_cast %4 : vector<8x1xf32> to vector<8x1xf32>
    %6 = vector.broadcast %5 : vector<8x1xf32> to vector<8x256xf32>
    %c0_7 = arith.constant 0 : index
    %c0_8 = arith.constant 0 : index
    %7 = vector.load %arg4[%c0_7, %c0_8] : memref<8x4xf32, #tpu.memory_space<vmem>>, vector<8x4xf32>
    %c0_9 = arith.constant 0 : index
    %c0_10 = arith.constant 0 : index
    %8 = vector.load %arg5[%c0_9, %c0_10] : memref<8x4xf32, #tpu.memory_space<vmem>>, vector<8x4xf32>
    %9 = vector.extract_strided_slice %7 {offsets = [0, 0], sizes = [8, 1], strides = [1, 1]} : vector<8x4xf32> to vector<8x1xf32>
    %10 = vector.extract_strided_slice %1 {offsets = [0, 0], sizes = [1, 256], strides = [1, 1]} : vector<4x256xf32> to vector<1x256xf32>
    %11 = vector.broadcast %9 : vector<8x1xf32> to vector<8x256xf32>
    %12 = vector.broadcast %10 : vector<1x256xf32> to vector<8x256xf32>
    %13 = arith.mulf %11, %12 : vector<8x256xf32>
    %14 = arith.addf %6, %13 : vector<8x256xf32>
    %15 = vector.extract_strided_slice %7 {offsets = [0, 1], sizes = [8, 1], strides = [1, 1]} : vector<8x4xf32> to vector<8x1xf32>
    %16 = vector.extract_strided_slice %1 {offsets = [1, 0], sizes = [1, 256], strides = [1, 1]} : vector<4x256xf32> to vector<1x256xf32>
    %17 = vector.broadcast %15 : vector<8x1xf32> to vector<8x256xf32>
    %18 = vector.broadcast %16 : vector<1x256xf32> to vector<8x256xf32>
    %19 = arith.mulf %17, %18 : vector<8x256xf32>
    %20 = arith.addf %14, %19 : vector<8x256xf32>
    %21 = vector.extract_strided_slice %7 {offsets = [0, 2], sizes = [8, 1], strides = [1, 1]} : vector<8x4xf32> to vector<8x1xf32>
    %22 = vector.extract_strided_slice %1 {offsets = [2, 0], sizes = [1, 256], strides = [1, 1]} : vector<4x256xf32> to vector<1x256xf32>
    %23 = vector.broadcast %21 : vector<8x1xf32> to vector<8x256xf32>
    %24 = vector.broadcast %22 : vector<1x256xf32> to vector<8x256xf32>
    %25 = arith.mulf %23, %24 : vector<8x256xf32>
    %26 = arith.addf %20, %25 : vector<8x256xf32>
    %27 = vector.extract_strided_slice %7 {offsets = [0, 3], sizes = [8, 1], strides = [1, 1]} : vector<8x4xf32> to vector<8x1xf32>
    %28 = vector.extract_strided_slice %1 {offsets = [3, 0], sizes = [1, 256], strides = [1, 1]} : vector<4x256xf32> to vector<1x256xf32>
    %29 = vector.broadcast %27 : vector<8x1xf32> to vector<8x256xf32>
    %30 = vector.broadcast %28 : vector<1x256xf32> to vector<8x256xf32>
    %31 = arith.mulf %29, %30 : vector<8x256xf32>
    %32 = arith.addf %26, %31 : vector<8x256xf32>
    %33 = vector.extract_strided_slice %8 {offsets = [0, 0], sizes = [8, 1], strides = [1, 1]} : vector<8x4xf32> to vector<8x1xf32>
    %34 = vector.extract_strided_slice %3 {offsets = [0, 0], sizes = [1, 256], strides = [1, 1]} : vector<4x256xf32> to vector<1x256xf32>
    %35 = vector.broadcast %33 : vector<8x1xf32> to vector<8x256xf32>
    %36 = vector.broadcast %34 : vector<1x256xf32> to vector<8x256xf32>
    %37 = arith.mulf %35, %36 : vector<8x256xf32>
    %38 = arith.addf %32, %37 : vector<8x256xf32>
    %39 = vector.extract_strided_slice %8 {offsets = [0, 1], sizes = [8, 1], strides = [1, 1]} : vector<8x4xf32> to vector<8x1xf32>
    %40 = vector.extract_strided_slice %3 {offsets = [1, 0], sizes = [1, 256], strides = [1, 1]} : vector<4x256xf32> to vector<1x256xf32>
    %41 = vector.broadcast %39 : vector<8x1xf32> to vector<8x256xf32>
    %42 = vector.broadcast %40 : vector<1x256xf32> to vector<8x256xf32>
    %43 = arith.mulf %41, %42 : vector<8x256xf32>
    %44 = arith.addf %38, %43 : vector<8x256xf32>
    %45 = vector.extract_strided_slice %8 {offsets = [0, 2], sizes = [8, 1], strides = [1, 1]} : vector<8x4xf32> to vector<8x1xf32>
    %46 = vector.extract_strided_slice %3 {offsets = [2, 0], sizes = [1, 256], strides = [1, 1]} : vector<4x256xf32> to vector<1x256xf32>
    %47 = vector.broadcast %45 : vector<8x1xf32> to vector<8x256xf32>
    %48 = vector.broadcast %46 : vector<1x256xf32> to vector<8x256xf32>
    %49 = arith.mulf %47, %48 : vector<8x256xf32>
    %50 = arith.addf %44, %49 : vector<8x256xf32>
    %51 = vector.extract_strided_slice %8 {offsets = [0, 3], sizes = [8, 1], strides = [1, 1]} : vector<8x4xf32> to vector<8x1xf32>
    %52 = vector.extract_strided_slice %3 {offsets = [3, 0], sizes = [1, 256], strides = [1, 1]} : vector<4x256xf32> to vector<1x256xf32>
    %53 = vector.broadcast %51 : vector<8x1xf32> to vector<8x256xf32>
    %54 = vector.broadcast %52 : vector<1x256xf32> to vector<8x256xf32>
    %55 = arith.mulf %53, %54 : vector<8x256xf32>
    %56 = arith.addf %50, %55 : vector<8x256xf32>
    %cst = arith.constant 0.000000e+00 : f32
    %57 = vector.broadcast %cst : f32 to vector<8x256xf32>
    %58 = arith.maximumf %56, %57 : vector<8x256xf32>
    %c0_11 = arith.constant 0 : index
    %c0_12 = arith.constant 0 : index
    %59 = vector.load %arg7[%c0_11, %c0_12] : memref<8x1xf32, #tpu.memory_space<vmem>>, vector<8x1xf32>
    %60 = vector.broadcast %59 : vector<8x1xf32> to vector<8x256xf32>
    %61 = arith.mulf %58, %60 : vector<8x256xf32>
    %cst_13 = arith.constant dense<0.000000e+00> : vector<256xf32>
    %62 = vector.multi_reduction <add>, %61, %cst_13 [0] : vector<8x256xf32> to vector<256xf32>
    %63 = vector.shape_cast %62 : vector<256xf32> to vector<1x256xf32>
    %c0_14 = arith.constant 0 : index
    %c0_15 = arith.constant 0 : index
    %64 = vector.load %arg8[%c0_14, %c0_15] : memref<1x1xf32, #tpu.memory_space<vmem>>, vector<1x1xf32>
    %65 = vector.broadcast %64 : vector<1x1xf32> to vector<1x256xf32>
    %66 = arith.addf %63, %65 : vector<1x256xf32>
    %67 = arith.negf %66 : vector<1x256xf32>
    %68 = math.exp %67 : vector<1x256xf32>
    %cst_16 = arith.constant 1.000000e+00 : f32
    %69 = vector.broadcast %cst_16 : f32 to vector<1x256xf32>
    %70 = arith.addf %69, %68 : vector<1x256xf32>
    %71 = arith.divf %69, %70 : vector<1x256xf32>
    %72 = vector.broadcast %71 : vector<1x256xf32> to vector<4x256xf32>
    %73 = arith.mulf %3, %72 : vector<4x256xf32>
    %c0_17 = arith.constant 0 : index
    %c0_18 = arith.constant 0 : index
    %c0_19 = arith.constant 0 : index
    %74 = vector.load %arg9[%c0_17, %c0_18, %c0_19] : memref<1x4x256xf32, #tpu.memory_space<vmem>>, vector<1x4x256xf32>
    %75 = vector.shape_cast %74 : vector<1x4x256xf32> to vector<4x256xf32>
    %76 = vector.shape_cast %73 : vector<4x256xf32> to vector<1x4x256xf32>
    tpu.vector_store %arg9[%c0_17, %c0_18, %c0_19], %76 {strides = array<i32>} : memref<1x4x256xf32, #tpu.memory_space<vmem>>, vector<1x4x256xf32>,
    return
  }
  func.func @transform_0(%arg0: i32, %arg1: i32) -> (i32, i32, i32) {
    %c0_i32 = arith.constant 0 : i32
    %c0_i32_0 = arith.constant 0 : i32
    return %arg1, %c0_i32, %arg0 : i32, i32, i32
  }
  func.func @transform_1(%arg0: i32, %arg1: i32) -> (i32, i32, i32) {
    %c0_i32 = arith.constant 0 : i32
    %c0_i32_0 = arith.constant 0 : i32
    return %arg1, %c0_i32, %arg0 : i32, i32, i32
  }
  func.func @transform_2(%arg0: i32, %arg1: i32) -> (i32, i32) {
    %c0_i32 = arith.constant 0 : i32
    %c0_i32_0 = arith.constant 0 : i32
    %c0_i32_1 = arith.constant 0 : i32
    return %c0_i32, %c0_i32_0 : i32, i32
  }
  func.func @transform_3(%arg0: i32, %arg1: i32) -> (i32, i32) {
    %c0_i32 = arith.constant 0 : i32
    %c0_i32_0 = arith.constant 0 : i32
    %c0_i32_1 = arith.constant 0 : i32
    return %c0_i32, %c0_i32_0 : i32, i32
  }
  func.func @transform_4(%arg0: i32, %arg1: i32) -> (i32, i32) {
    %c0_i32 = arith.constant 0 : i32
    %c0_i32_0 = arith.constant 0 : i32
    %c0_i32_1 = arith.constant 0 : i32
    return %c0_i32, %c0_i32_0 : i32, i32
  }
  func.func @transform_5(%arg0: i32, %arg1: i32) -> (i32, i32) {
    %c0_i32 = arith.constant 0 : i32
    %c0_i32_0 = arith.constant 0 : i32
    %c0_i32_1 = arith.constant 0 : i32
    return %c0_i32, %c0_i32_0 : i32, i32
  }
  func.func @transform_6(%arg0: i32, %arg1: i32) -> (i32, i32) {
    %c0_i32 = arith.constant 0 : i32
    %c0_i32_0 = arith.constant 0 : i32
    %c0_i32_1 = arith.constant 0 : i32
    return %c0_i32, %c0_i32_0 : i32, i32
  }
  func.func @transform_7(%arg0: i32, %arg1: i32) -> (i32, i32, i32) {
    %c0_i32 = arith.constant 0 : i32
    %c0_i32_0 = arith.constant 0 : i32
    return %arg1, %c0_i32, %arg0 : i32, i32, i32
  }
}

</mosaic_0001>

<bundles_post_ra>
// kernel: tpu_custom_call.1
= control target key start
LH: loop header
LB: loop body
LE: loop exit
PB: predicated region body
PF: predicated region fallthrough
CT: control target
= control target key end

     0   :  { %s1122_s0 = inlined_call_operand.vmem [shape: f32[2,4,256], index: 0, kind: input, shape index: {}]   ;;  %s1123_s1 = inlined_call_operand.vmem [shape: f32[2,4,256], index: 1, kind: input, shape index: {}]   ;;  %s1124_s2 = inlined_call_operand.vmem [shape: f32[8,4], index: 2, kind: input, shape index: {}]   ;;  %s1125_s3 = inlined_call_operand.vmem [shape: f32[8,4], index: 3, kind: input, shape index: {}]   ;;  %s1126_s4 = inlined_call_operand.vmem [shape: f32[8,1], index: 4, kind: input, shape index: {}]   ;;  %s1127_s5 = inlined_call_operand.vmem [shape: f32[8,1], index: 5, kind: input, shape index: {}]   ;;  %s1128_s6 = inlined_call_operand.<no memory space> [shape: f32[1,1], index: 6, kind: input, shape index: {}]   ;;  %s1129_s7 = inlined_call_operand.hbm [shape: f32[2,4,256], index: 7, kind: output, shape index: {}]  }
   0x1   :  { %v12_v0 = vstv %s1128_s6 }
   0x2   :  { %13 = vst [vmem:[#allocation2] sm:$0x1] %v12_v0 }
   0x3   :  { %14 = vsyncpa [#allocation4], 0 }
   0x4   :  { %16 = vsyncpa [#allocation4 + $0x1], 0  ;;  %s954_s26 = smov 0   ;;  %s956_s27 = smov 0  }
   0x5   :  { %s958_s28 = smov 0   ;;  %s960_s29 = smov 0  }
   0x6   :  { %s962_s30 = smov 0   ;;  %s964_s8 = smov 0  }
   0x7 LB: > { %s731_s6 = sadd.s32 4294967295, %s904_s8   ;;  %s732_s9 = sadd.s32 4294967294, %s904_s8   ;;  %s904_s8 = sphi %s964_s8, %s22_s8   ;;  %s900_s30 = sphi %s962_s30, %s1136_s30   ;;  %s896_s29 = sphi %s960_s29, %s1135_s29   ;;  %s892_s28 = sphi %s958_s28, %s1134_s28   ;;  %s888_s27 = sphi %s956_s27, %s1133_s27   ;;  %s884_s26 = sphi %s954_s26, %s1132_s26  }
   0x8   : > { %s31_s10 = sadd.s32 1, %s900_s30  ;;  %s204_s11 = sadd.s32 1, %s892_s28 }
   0x9   : > { %p32_p0 = scmp.ge.s32.totalorder %s31_s10, 2  ;;  %p214_p1 = scmp.ne.s32.totalorder %s892_s28, %s888_s27 }
   0xa   : > { %p215_p2 = scmp.eq.s32.totalorder %s731_s6, 1  ;;  %p220_p3 = scmp.ne.s32.totalorder %s888_s27, %s884_s26 }
   0xb   : > { %s1138_s10 = smov (%p32_p0, %s31_s10), 0  ;;  %p221_p5 = scmp.eq.s32.totalorder %s732_s9, 1 }
   0xc   : > { %p994_p4 = por %p215_p2, %p214_p1  ;;  %s199_s13 = ssub.s32 %s900_s30, %s1138_s10 }
   0xd   : > { %p735_p6 = scmp.ge.s32.totalorder %s904_s8, 1  ;;  %p202_p7 = scmp.eq.s32.totalorder %s199_s13, 0 }
   0xe   : > { %p1001_p8 = por %p221_p5, %p220_p3  ;;  %p280_p9 = scmp.lt.s32.totalorder %s904_s8, 3 }
   0xf   : > { %s1007_s15 = scalar_select %p202_p7, %s892_s28, %s204_s11  }
  0x10   : > { %p281_p10 = pnand %p735_p6, %p280_p9 }
  0x11   : > { %p326_p11 = scmp.lt.s32.totalorder (!%p281_p10), %s896_s29, 1  ;;  %s322_s18 = sand.u32 (!%p281_p10), 1, %s888_s27  }
  0x12   : > { %284 = sbr.rel (%p281_p10) target bundleno = 241 (0xf1), region = 48  ;;  %s736_s19 = sshll.u32 (!%p281_p10), %s322_s18, 3 }
  0x13   : > { %s750_s20 = sshll.u32 (!%p281_p10), %s896_s29, 7  ;;  %s324_s21 = scalar_lea.vmem (!%p281_p10), [#allocation3], %s736_s19 }
  0x14   : > { %s637_s22 = sshll.u32 (!%p281_p10), %s324_s21, 4  ;;  %s621_s6 = scalar_lea.sflag (!%p281_p10), [#allocation4], %s322_s18  ;;  %s638_s22 = int_to_ptr.vmem [resolvable:$true] %s637_s22 }
  0x15   : > { %s828_s9 = scalar_lea.vmem (!%p281_p10), %s638_s22, 128 }
  0x16   : > { %p829_p12 = scmp.ne.s32.totalorder (!%p281_p10), %s638_s22, %s828_s9 }
  0x17   : > { %v354_v1 = vld [vmem:[%s1124_s2] sm:$0xff]  ;;  %v906_v2 = vmov 1   ;;  %v907_v3 = vmov 0   ;;  %v908_v5 = vmov 2   ;;  %v909_v7 = vmov 3   ;;  %s327_s24 = scalar_select %p326_p11, %s896_s29, 1 }
  0x18   : > { %811 = vset.pattern.permute.xlu1 %v906_v2  ;;  %810 = vset.pattern.permute.xlu0 %v907_v3  ;;  %v348_v4 = vld [vmem:[%s1126_s4] sm:$0xff]  ;;  %v362_v10 = vlaneseq  ;;  %p830_p13 = pnand %p829_p12, %p994_p4 }
  0x19   : > { %385 = vperm.xlu1 %811, %v354_v1   ;;  %358 = vperm.xlu0 %810, %v354_v1   ;;  %v355_v6 = vld [vmem:[%s1125_s3] sm:$0xff]  ;;  %s748_s25 = sshll.u32 %s327_s24, 3 }
  0x1a   : > { %v590_v8 = vld [vmem:[#allocation2] sm:$0x1]  ;;  %v1023_v11 = vshrl.u32 %v362_v10, 7  ;;  %s333_s11 = scalar_lea.vmem %s1122_s0, %s748_s25  ;;  %s343_s17 = scalar_lea.vmem %s1123_s1, %s748_s25 }
  0x1b   : > { %v570_v9 = vld [vmem:[%s1127_s5] sm:$0xff]  ;;  %s635_s25 = scalar_lea.hbm %s1129_s7, %s750_s20  ;;  %p831_p0 = pneg %p830_p13 }
  0x1c   : > { %v1029_v12 = vsub.s32 0, %v1023_v11  ;;  %v368_v13 = vsub.s32 4, %v1023_v11  ;;  %v346_v14 = vld [vmem:[%s333_s11] sm:$0xff]  ;;  %v1033_v15 = vsub.s32 1, %v1023_v11  ;;  %v394_v16 = vsub.s32 5, %v1023_v11  ;;  %s910_s11 = smov [#allocation3]  }
  0x1d   : > { %812 = vset.pattern.permute.xlu1 %v908_v5  ;;  %351 = vperm.xlu0 %810, %v348_v4   ;;  %v1038_v19 = vsub.s32 2, %v1023_v11  ;;  %v420_v20 = vsub.s32 6, %v1023_v11  ;;  %v1042_v21 = vsub.s32 3, %v1023_v11  ;;  %v446_v22 = vsub.s32 7, %v1023_v11  ;;  %v1052_v30 = vld [vmem:[%s343_s17] sm:$0xff]  ;;  %s832_s13 = sshll.u32 %s910_s11, 4  ;;  %s833_s13 = int_to_ptr.vmem [resolvable:$false] %s832_s13 }
  0x1e   : > { %411 = vperm.xlu1 %812, %v354_v1   ;;  %v365_v17 = vrot.slane %v346_v14, %v1029_v12  ;;  %v369_v18 = vrot.slane %v346_v14, %v368_v13  ;;  %v391_v23 = vrot.slane %v346_v14, %v1033_v15  ;;  %v395_v24 = vrot.slane %v346_v14, %v394_v16  ;;  %s834_s29 = scalar_lea.vmem %s833_s13, 256  ;;  %p835_p1 = scmp.lt.s32.totalorder %s638_s22, %s833_s13 }
  0x1f   : > { %v417_v27 = vrot.slane %v346_v14, %v1038_v19  ;;  %v421_v28 = vrot.slane %v346_v14, %v420_v20  ;;  %v443_v32 = vrot.slane %v346_v14, %v1042_v21  ;;  %v447_v33 = vrot.slane %v346_v14, %v446_v22  ;;  %p836_p2 = scmp.lt.s32.totalorder %s834_s29, %s828_s9 }
  0x20   : > { %v375_v25 = vrot.slane %v365_v17, %v1029_v12  ;;  %v379_v26 = vrot.slane %v369_v18, %v1029_v12  ;;  %v401_v34 = vrot.slane %v391_v23, %v1033_v15  ;;  %v405_v35 = vrot.slane %v395_v24, %v1033_v15 }
  0x21   : > { %813 = vset.pattern.permute.xlu0 %v909_v7  ;;  %v427_v38 = vrot.slane %v417_v27, %v1038_v19  ;;  %v431_v39 = vrot.slane %v421_v28, %v1038_v19  ;;  %v471_v40 = vrot.slane %v1052_v30, %v1029_v12  ;;  %v475_v41 = vrot.slane %v1052_v30, %v368_v13  ;;  %p837_p3 = por %p836_p2, %p835_p1 }
  0x22   : > { %814 = vset.pattern.permute.xlu1 %v907_v3  ;;  %437 = vperm.xlu0 %813, %v354_v1   ;;  %v453_v43 = vrot.slane %v443_v32, %v1042_v21  ;;  %v457_v44 = vrot.slane %v447_v33, %v1042_v21  ;;  %v497_v52 = vrot.slane %v1052_v30, %v1033_v15 }
  0x23   : > { %464 = vperm.xlu1 %814, %v355_v6   ;;  %v501_v53 = vrot.slane %v1052_v30, %v394_v16  ;;  %v481_v56 = vrot.slane %v471_v40, %v1029_v12  ;;  %v485_v57 = vrot.slane %v475_v41, %v1029_v12  ;;  %v523_v58 = vrot.slane %v1052_v30, %v1038_v19  ;;  %p838_p5 = pnand %p837_p3, %p831_p0 }
  0x24   : > { %v527_v59 = vrot.slane %v1052_v30, %v420_v20  ;;  %v507_v4 = vrot.slane %v497_v52, %v1033_v15  ;;  %v549_v10 = vrot.slane %v1052_v30, %v1042_v21  ;;  %v553_v11 = vrot.slane %v1052_v30, %v446_v22 }
  0x26   : > { %816 = vset.pattern.permute.xlu0 %v908_v5  ;;  %v511_v5 = vrot.slane %v501_v53, %v1033_v15  ;;  %v559_v15 = vrot.slane %v549_v10, %v1042_v21 }
  0x27   : > { %815 = vset.pattern.permute.xlu1 %v906_v2  ;;  %517 = vperm.xlu0 %816, %v355_v6  }
  0x28   : > { %491 = vperm.xlu1 %815, %v355_v6  }
  0x2b   : > { %819 = vset.pattern.permute.xlu0 %v907_v3 }
  0x2c   : > { %817 = vset.pattern.permute.xlu1 %v909_v7  ;;  %593 = vperm.xlu0 %819, %v590_v8   ;;  %v533_v8 = vrot.slane %v523_v58, %v1038_v19 }
  0x2d   : > { %543 = vperm.xlu1 %817, %v355_v6  }
  0x31   : > { %818 = vset.pattern.permute.xlu1 %v907_v3 }
  0x32   : > { %573 = vperm.xlu1 %818, %v570_v9   ;;  %v537_v9 = vrot.slane %v527_v59, %v1038_v19 }
  0x94   : > { %v386_v29 = vpop.permute.xlu1 %385  ;;  %v359_v31 = vpop.permute.xlu0 %358 }
  0x95   : > { %v380_v36 = vmul.f32 %v375_v25, %v359_v31  ;;  %v381_v37 = vmul.f32 %v379_v26, %v359_v31  ;;  %v406_v45 = vmul.f32 %v401_v34, %v386_v29  ;;  %v407_v46 = vmul.f32 %v405_v35, %v386_v29 }
  0x96   : > { %v563_v25 = vrot.slane %v553_v11, %v1042_v21 }
  0x98   : > { %v352_v42 = vpop.permute.xlu0 %351 }
  0x99   : > { %v382_v47 = vadd.f32 %v380_v36, %v352_v42  ;;  %v383_v48 = vadd.f32 %v381_v37, %v352_v42  ;;  %v412_v49 = vpop.permute.xlu1 %411 }
  0x9a   : > { %v432_v50 = vmul.f32 %v427_v38, %v412_v49  ;;  %v433_v51 = vmul.f32 %v431_v39, %v412_v49 }
  0x9b   : > { %v408_v54 = vadd.f32 %v406_v45, %v382_v47  ;;  %v409_v55 = vadd.f32 %v407_v46, %v383_v48 }
  0x9d   : > { %v434_v60 = vadd.f32 %v432_v50, %v408_v54  ;;  %v435_v61 = vadd.f32 %v433_v51, %v409_v55  ;;  %v438_v62 = vpop.permute.xlu0 %437 }
  0x9e   : > { %v458_v63 = vmul.f32 %v453_v43, %v438_v62  ;;  %v459_v0 = vmul.f32 %v457_v44, %v438_v62  ;;  %v465_v1 = vpop.permute.xlu1 %464 }
  0x9f   : > { %v486_v2 = vmul.f32 %v481_v56, %v465_v1  ;;  %v487_v3 = vmul.f32 %v485_v57, %v465_v1 }
  0xa0   : > { %v460_v6 = vadd.f32 %v458_v63, %v434_v60  ;;  %v461_v7 = vadd.f32 %v459_v0, %v435_v61 }
  0xa2   : > { %v518_v13 = vpop.permute.xlu0 %517  ;;  %v488_v14 = vadd.f32 %v486_v2, %v460_v6  ;;  %v489_v16 = vadd.f32 %v487_v3, %v461_v7 }
  0xa3   : > { %v492_v17 = vpop.permute.xlu1 %491  ;;  %v538_v23 = vmul.f32 %v533_v8, %v518_v13  ;;  %v539_v24 = vmul.f32 %v537_v9, %v518_v13 }
  0xa4   : > { %v512_v18 = vmul.f32 %v507_v4, %v492_v17  ;;  %v513_v20 = vmul.f32 %v511_v5, %v492_v17 }
  0xa6   : > { %v514_v26 = vadd.f32 %v512_v18, %v488_v14  ;;  %v515_v27 = vadd.f32 %v513_v20, %v489_v16 }
  0xa7   : > { %v594_v44 = vpop.permute.xlu0 %593 }
  0xa8   : > { %v540_v19 = vadd.f32 %v538_v23, %v514_v26  ;;  %v541_v28 = vadd.f32 %v539_v24, %v515_v27  ;;  %v544_v29 = vpop.permute.xlu1 %543  ;;  %v599_v49 = vrot.slane %v594_v44, %v1029_v12 }
  0xa9   : > { %v564_v31 = vmul.f32 %v559_v15, %v544_v29  ;;  %v565_v32 = vmul.f32 %v563_v25, %v544_v29 }
  0xab   : > { %v566_v22 = vadd.f32 %v564_v31, %v540_v19  ;;  %v567_v33 = vadd.f32 %v565_v32, %v541_v28 }
  0xad   : > { %v574_v34 = vpop.permute.xlu1 %573  ;;  %v568_v35 = vmax.f32 %v566_v22, 0.0  ;;  %v569_v36 = vmax.f32 %v567_v33, 0.0 }
  0xaf   : > { %v576_v37 = vmul.f32 %v574_v34, %v568_v35  ;;  %v577_v38 = vmul.f32 %v574_v34, %v569_v36 }
  0xb1   : > { %v578_v39 = vrot.slane %v576_v37, 4  ;;  %v584_v40 = vrot.slane %v577_v38, 4 }
  0xb3   : > { %v579_v41 = vadd.f32 %v578_v39, %v576_v37  ;;  %v585_v42 = vadd.f32 %v584_v40, %v577_v38 }
  0xb5   : > { %v580_v43 = vrot.slane %v579_v41, 2  ;;  %v586_v21 = vrot.slane %v585_v42, 2 }
  0xb7   : > { %v581_v45 = vadd.f32 %v580_v43, %v579_v41  ;;  %v587_v46 = vadd.f32 %v586_v21, %v585_v42 }
  0xb9   : > { %v582_v47 = vrot.slane %v581_v45, 1  ;;  %v588_v48 = vrot.slane %v587_v46, 1 }
  0xbb   : > { %v583_v50 = vadd.f32 %v582_v47, %v581_v45  ;;  %v589_v51 = vadd.f32 %v588_v48, %v587_v46 }
  0xbd   : > { %v600_v52 = vadd.f32 %v599_v49, %v583_v50  ;;  %v601_v53 = vadd.f32 %v599_v49, %v589_v51 }
  0xbf   : > { %v741_v54 = vmul.f32 -1.442695, %v600_v52  ;;  %v742_v55 = vmul.f32 -1.442695, %v601_v53 }
  0xc1   : > { %820 = vpow2.f32 %v741_v54 }
  0xc2   : > { %822 = vpow2.f32 %v742_v55 }
  0xce   : > { %v821_v56 = vpop.eup %820 }
  0xcf   : > { %v823_v57 = vpop.eup %822  ;;  %v608_v58 = vadd.f32 1.0, %v821_v56 }
  0xd0   : > { %v609_v59 = vadd.f32 1.0, %v823_v57 }
  0xd1   : > { %824 = vrcp.f32 %v608_v58 }
  0xd2   : > { %826 = vrcp.f32 %v609_v59 }
  0xde   : > { %v825_v60 = vpop.eup %824 }
  0xdf   : > { %v827_v12 = vpop.eup %826 }
  0xe0   : > { %v616_v61 = vcombine.low %v825_v60, %v827_v12 }
  0xe2   : > { %v618_v62 = vmul.f32 %v616_v61, %v1052_v30 }
  0xe4   : > { %619 = vst [vmem:[%s324_s21] sm:$0xff] %v618_v62 }
  0xe5   : > { %841 = shalt.err (!%p838_p5)
}
  0xe6   : > { %s842_s16 = scalar_lea.hbm %s635_s25, 128  ;;  %s846_s19 = scalar_lea.hbm %s1129_s7, 256 }
  0xe7   : > { %p843_p6 = scmp.ne.s32.totalorder %s635_s25, %s842_s16  ;;  %p847_p10 = scmp.lt.s32.totalorder %s635_s25, %s1129_s7 }
  0xe8   : > { %p848_p11 = scmp.lt.s32.totalorder %s846_s19, %s842_s16 }
  0xe9   : > { %p844_p7 = pnand %p843_p6, %p994_p4 }
  0xea   : > { %p849_p12 = por %p848_p11, %p847_p10 }
  0xeb   : > { %p845_p9 = pneg %p844_p7 }
  0xed   : > { %p850_p13 = pnand %p849_p12, %p845_p9 }
  0xef   : > { %853 = shalt.err (!%p850_p13)
}
  0xf0   : > { %751 = dma.vmem_to_hbm [thread:$0]  (%p994_p4), %s638_s22, 128, %s635_s25, %s621_s6  }
  0xf1 PF: > { %p757_p0 = scmp.ge.s32.totalorder %s904_s8, 2  ;;  %s649_s23 = sand.u32 1, %s884_s26  }
  0xf2   : > { %s650_s24 = scalar_lea.sflag [#allocation4], %s649_s23 }
  0xf3   : > { %p754_p1 = pnand %p757_p0, %p1001_p8 }
  0xf5   : > { %p755_p2 = pneg %p754_p1 }
  0xf7   : > { %879 = dma.done.wait (%p755_p2), %s650_s24, 128  }
  0xf8   : > { %881 = vsyncadd (%p755_p2), %s650_s24, 4294967168  ;;  %s22_s8 = sadd.s32 1, %s904_s8   ;;  %s1132_s26 = smov %s888_s27 }
  0xf9   : > { %p19_p3 = scmp.ge.s32.totalorder %s22_s8, 4   ;;  %s1133_s27 = smov %s892_s28 }
  0xfa   : > { %s1134_s28 = smov %s1007_s15  ;;  %s1135_s29 = smov %s900_s30 }
  0xfb   : > { %s1136_s30 = smov %s1138_s10  ;;  %21 = sbr.rel (!%p19_p3) target bundleno = 7 (0x7), region = 86 }
 0x100   :  { %655 = vsyncpa [#allocation4], 1 }
 0x101   :  { %657 = vsyncpa [#allocation4 + $0x1], 1 }

</bundles_post_ra>
